<compile_context>
chip_gen: v6e
topology: v6e:2x2x1
jax: 0.10.0
libtpu: 0.0.40
codegen_flags: <defaults>
</compile_context>

<pallas_src>
import jax
import jax.numpy as jnp
from jax.experimental import pallas as pl
from jax.experimental.pallas import tpu as pltpu


def _round_up(x, m):
    return (x + m - 1) // m * m


# ----------------------------------------------------------------------------
# Kernel 1: node MLP (transposed layout), one node-chunk per grid step
# ----------------------------------------------------------------------------
def mlp_kernel(zT_ref, w1T_ref, b1_ref, w2T_ref, b2_ref, featsT_ref):
    # zT : (L_pad, chunk)   w1T : (H_pad, L_pad)   w2T : (F_pad, H_pad)
    h = jnp.dot(w1T_ref[...], zT_ref[...],
                preferred_element_type=jnp.float32)              # (H_pad, chunk)
    h = jnp.maximum(h + b1_ref[...], 0.0)                        # bias + ReLU
    f = jnp.dot(w2T_ref[...], h,
                preferred_element_type=jnp.float32) + b2_ref[...]  # (F_pad, chunk)
    featsT_ref[0] = f.astype(featsT_ref.dtype)                   # bf16 out


# ----------------------------------------------------------------------------
# Kernel 2: per-edge dot products via chunked bf16 one-hot gather on the MXU
# ----------------------------------------------------------------------------
def _make_edge_kernel(*, chunk, n_chunks, tile_e, f_pad):
    def kernel(idx_ref, featsT_ref, out_ref):
        # idx_ref    : (2, tile_e) int32        (src row, dst row)
        # featsT_ref : (n_chunks, f_pad, chunk) bf16, resident
        # out_ref    : (1, tile_e) f32          lane-dense output tile
        src = idx_ref[0:1, :]                                    # (1, tile_e)
        dst = idx_ref[1:2, :]                                    # (1, tile_e)
        sd = jnp.concatenate([src, dst], axis=1)                 # (1, 2*tile_e)

        def chunk_contrib(c):
            f_c = featsT_ref[c]                                  # (f_pad, chunk) bf16
            ids = jax.lax.broadcasted_iota(
                jnp.int32, (chunk, 2 * tile_e), 0) + c * chunk
            oh = (ids == sd).astype(jnp.bfloat16)                # exact 0/1 in bf16
            # fused src+dst gather, f32 accumulation on the MXU
            return jnp.dot(f_c, oh, preferred_element_type=jnp.float32)

        if n_chunks == 1:
            g = chunk_contrib(0)                                 # (f_pad, 2*tile_e)
        else:
            g = jax.lax.fori_loop(
                0, n_chunks,
                lambda c, acc: acc + chunk_contrib(c),
                jnp.zeros((f_pad, 2 * tile_e), jnp.float32),
                unroll=(n_chunks <= 4))

        zs = g[:, :tile_e]                                       # feats[src].T
        zd = g[:, tile_e:]                                       # feats[dst].T
        logit = jnp.sum(zs * zd, axis=0, keepdims=True)          # (1, tile_e)
        out_ref[...] = jax.nn.sigmoid(logit).astype(out_ref.dtype)

    return kernel


# ----------------------------------------------------------------------------
# Wrapper: layout plumbing (transpose / pad) + two pallas_calls
# ----------------------------------------------------------------------------
def decoder_forward(z, edge_index, params, *, tile_e=None, node_chunk=1024):
    w1, b1, w2, b2 = params              # w1:(L,H) b1:(1,H) w2:(H,F) b2:(1,F)
    N, L = z.shape
    H = w1.shape[1]
    F = w2.shape[1]
    E = edge_index.shape[1]

    f32 = jnp.float32
    bf16 = jnp.bfloat16

    # Sublane-pad the small feature dims, lane-pad the node axis to 128.
    L_pad = _round_up(L, 8)
    H_pad = _round_up(H, 8)
    F_pad = _round_up(F, 8)

    n_raw = _round_up(max(N, 1), 128)
    chunk = min(node_chunk, n_raw)               # node-chunk = gather contraction tile
    n_pad = _round_up(n_raw, chunk)
    n_chunks = n_pad // chunk

    if tile_e is None:
        # N-aware edge tiles: fat tiles for small graphs (amortize per-step
        # overhead), bounded for big graphs so one-hot temps stay in VMEM.
        tile_e = 2048 if n_pad <= 4096 else 512
        tile_e = min(tile_e, _round_up(max(E, 1), 128))
    e_pad = _round_up(max(E, 1), tile_e)
    n_tiles_e = e_pad // tile_e

    # One-time wrapper-side layout plumbing (node axis -> lanes); all padding
    # is with zeros so padded rows/cols contribute nothing to the edge scores.
    zT = jnp.zeros((L_pad, n_pad), f32).at[:L, :N].set(z.T.astype(f32))
    w1T = jnp.zeros((H_pad, L_pad), f32).at[:H, :L].set(w1.T.astype(f32))
    b1c = jnp.zeros((H_pad, 1), f32).at[:H, :].set(b1.reshape(H, 1).astype(f32))
    w2T = jnp.zeros((F_pad, H_pad), f32).at[:F, :H].set(w2.T.astype(f32))
    b2c = jnp.zeros((F_pad, 1), f32).at[:F, :].set(b2.reshape(F, 1).astype(f32))
    eidx = jnp.zeros((2, e_pad), jnp.int32).at[:, :E].set(
        edge_index.astype(jnp.int32))

    # ---- Kernel 1: MLP over node chunks (parallel grid) ----
    mlp_cost = pl.CostEstimate(
        flops=2 * n_pad * (L_pad * H_pad + H_pad * F_pad),
        transcendentals=0,
        bytes_accessed=(zT.size + w1T.size + b1c.size + w2T.size + b2c.size) * 4
        + n_chunks * F_pad * chunk * 2,
    )
    featsT = pl.pallas_call(
        mlp_kernel,
        out_shape=jax.ShapeDtypeStruct((n_chunks, F_pad, chunk), bf16),
        grid=(n_chunks,),
        in_specs=[
            pl.BlockSpec((L_pad, chunk), lambda c: (0, c)),      # zT chunk
            pl.BlockSpec((H_pad, L_pad), lambda c: (0, 0)),      # w1T (tiny, resident)
            pl.BlockSpec((H_pad, 1), lambda c: (0, 0)),          # b1
            pl.BlockSpec((F_pad, H_pad), lambda c: (0, 0)),      # w2T
            pl.BlockSpec((F_pad, 1), lambda c: (0, 0)),          # b2
        ],
        out_specs=pl.BlockSpec((1, F_pad, chunk), lambda c: (c, 0, 0)),
        compiler_params=pltpu.CompilerParams(
            dimension_semantics=("parallel",)),
        cost_estimate=mlp_cost,
    )(zT, w1T, b1c, w2T, b2c)

    # ---- Kernel 2: edge scoring (parallel grid; featsT resident) ----
    edge_kernel = _make_edge_kernel(
        chunk=chunk, n_chunks=n_chunks, tile_e=tile_e, f_pad=F_pad)

    edge_cost = pl.CostEstimate(
        flops=4 * F_pad * n_pad * e_pad + 3 * F_pad * e_pad,
        transcendentals=e_pad,
        bytes_accessed=featsT.size * 2 + eidx.size * 4 + e_pad * 4,
    )

    # VMEM budget: resident featsT (x2 pipeline buffers) + per-tile temporaries
    # (bf16 one-hot chunk, f32 gather accumulator, idx/out tiles).  Capped well
    # below v7x's 64 MiB physical VMEM.
    feats_bytes = n_chunks * F_pad * chunk * 2
    temp_bytes = (chunk * 2 * tile_e * 2          # one-hot (bf16)
                  + F_pad * 2 * tile_e * 4        # gather accumulator (f32)
                  + 2 * tile_e * 4 * 2            # edge-id tiles
                  + 8 * tile_e * 4 * 2)           # output tiles (sublane padded)
    vmem_limit = int(min(max(2 * (2 * feats_bytes + temp_bytes),
                             32 * 1024 * 1024),
                         48 * 1024 * 1024))

    out = pl.pallas_call(
        edge_kernel,
        out_shape=jax.ShapeDtypeStruct((1, e_pad), f32),
        grid=(n_tiles_e,),
        in_specs=[
            pl.BlockSpec((2, tile_e), lambda e: (0, e)),              # edge ids
            pl.BlockSpec((n_chunks, F_pad, chunk), lambda e: (0, 0, 0)),  # featsT
        ],
        out_specs=pl.BlockSpec((1, tile_e), lambda e: (0, e)),        # lane-dense
        compiler_params=pltpu.CompilerParams(
            dimension_semantics=("parallel",),
            vmem_limit_bytes=vmem_limit),
        cost_estimate=edge_cost,
    )(eidx, featsT)

    return out[0, :E]                     # -> [E], matching torch output shape


# ----------------------------------------------------------------------------
# Pure-JAX reference for correctness
# ----------------------------------------------------------------------------
def decoder_reference(z, edge_index, params):
    w1, b1, w2, b2 = params
    h = jnp.maximum(z @ w1 + b1, 0.0)
    f = h @ w2 + b2
    s = jnp.sum(f[edge_index[0]] * f[edge_index[1]], axis=1)
    return jax.nn.sigmoid(s)


if __name__ == "__main__":
    # Module hyperparameters (small, consistent with the forward pass)
    num_node_features = 16
    hidden_channels = 32
    latent_dims = 8
    N = 8    # number of nodes
    E = 16   # number of edges

    key = jax.random.PRNGKey(0)
    k_z, k_e, k_w1, k_b1, k_w2, k_b2 = jax.random.split(key, 6)

    # Inputs
    z = jax.random.normal(k_z, (N, latent_dims), dtype=jnp.float32)
    edge_index = jax.random.randint(k_e, (2, E), 0, N, dtype=jnp.int32)

    # Deterministic parameter init (nn.Linear-style ranges; stored in the
    # math orientation x @ W so the reference is plain z @ w1 + b1).
    lim1 = 1.0 / jnp.sqrt(latent_dims)
    lim2 = 1.0 / jnp.sqrt(hidden_channels)
    w1 = jax.random.uniform(k_w1, (latent_dims, hidden_channels),
                            minval=-lim1, maxval=lim1, dtype=jnp.float32)
    b1 = jax.random.uniform(k_b1, (1, hidden_channels),
                            minval=-lim1, maxval=lim1, dtype=jnp.float32)
    w2 = jax.random.uniform(k_w2, (hidden_channels, num_node_features),
                            minval=-lim2, maxval=lim2, dtype=jnp.float32)
    b2 = jax.random.uniform(k_b2, (1, num_node_features),
                            minval=-lim2, maxval=lim2, dtype=jnp.float32)
    params = (w1, b1, w2, b2)

    out = decoder_forward(z, edge_index, params)
    out = jax.block_until_ready(out)

    ref = decoder_reference(z, edge_index, params)
    assert out.shape == (E,)
    # featsT is stored in bf16 (gather matmuls run on the bf16 MXU path with
    # f32 accumulation), so allow ~1e-2 tolerance vs the pure-f32 reference.
    assert jnp.allclose(out, ref, atol=2e-2, rtol=2e-2), "mismatch vs reference"

    print("KERNEL_OK")
</pallas_src>

<mosaic_0001>
module attributes {stable_mosaic.version = 11 : i64} {
  func.func @mlp_kernel(%arg0: i32, %arg1: memref<8x128xf32, #tpu.memory_space<vmem>>, %arg2: memref<32x8xf32, #tpu.memory_space<vmem>>, %arg3: memref<32x1xf32, #tpu.memory_space<vmem>>, %arg4: memref<16x32xf32, #tpu.memory_space<vmem>>, %arg5: memref<16x1xf32, #tpu.memory_space<vmem>>, %arg6: memref<1x16x128xbf16, #tpu.memory_space<vmem>>) attributes {dimension_semantics = [#tpu.dimension_semantics<parallel>], iteration_bounds = array<i64: 1>, scalar_prefetch = 0 : i64, scratch_operands = 0 : i64, tpu.core_type = #tpu.core_type<tc>, window_params = [{transform_indices = @transform_0, window_bounds = array<i64: 8, 128>}, {pipeline_mode = #tpu.pipeline_mode<synchronous>, transform_indices = @transform_1, window_bounds = array<i64: 32, 8>}, {pipeline_mode = #tpu.pipeline_mode<synchronous>, transform_indices = @transform_2, window_bounds = array<i64: 32, 1>}, {pipeline_mode = #tpu.pipeline_mode<synchronous>, transform_indices = @transform_3, window_bounds = array<i64: 16, 32>}, {pipeline_mode = #tpu.pipeline_mode<synchronous>, transform_indices = @transform_4, window_bounds = array<i64: 16, 1>}, {transform_indices = @transform_5, window_bounds = array<i64: 1, 16, 128>}]} {
    %c0 = arith.constant 0 : index
    %c0_0 = arith.constant 0 : index
    %0 = vector.load %arg2[%c0, %c0_0] : memref<32x8xf32, #tpu.memory_space<vmem>>, vector<32x8xf32>
    %c0_1 = arith.constant 0 : index
    %c0_2 = arith.constant 0 : index
    %1 = vector.load %arg1[%c0_1, %c0_2] : memref<8x128xf32, #tpu.memory_space<vmem>>, vector<8x128xf32>
    %cst = arith.constant dense<0.000000e+00> : vector<32x128xf32>
    %2 = tpu.matmul %0, %1, %cst {dimension_numbers = #tpu.dot_dimension_numbers<[1], [0], [0], [1], [0, 0, 1, 1], [], []>} : vector<32x8xf32>, vector<8x128xf32>, vector<32x128xf32> -> vector<32x128xf32>
    %c0_3 = arith.constant 0 : index
    %c0_4 = arith.constant 0 : index
    %3 = vector.load %arg3[%c0_3, %c0_4] : memref<32x1xf32, #tpu.memory_space<vmem>>, vector<32x1xf32>
    %4 = vector.broadcast %3 : vector<32x1xf32> to vector<32x128xf32>
    %5 = arith.addf %2, %4 : vector<32x128xf32>
    %cst_5 = arith.constant 0.000000e+00 : f32
    %6 = vector.broadcast %cst_5 : f32 to vector<32x128xf32>
    %7 = arith.maximumf %5, %6 : vector<32x128xf32>
    %c0_6 = arith.constant 0 : index
    %c0_7 = arith.constant 0 : index
    %8 = vector.load %arg4[%c0_6, %c0_7] : memref<16x32xf32, #tpu.memory_space<vmem>>, vector<16x32xf32>
    %cst_8 = arith.constant dense<0.000000e+00> : vector<16x128xf32>
    %9 = tpu.matmul %8, %7, %cst_8 {dimension_numbers = #tpu.dot_dimension_numbers<[1], [0], [0], [1], [0, 0, 1, 1], [], []>} : vector<16x32xf32>, vector<32x128xf32>, vector<16x128xf32> -> vector<16x128xf32>
    %c0_9 = arith.constant 0 : index
    %c0_10 = arith.constant 0 : index
    %10 = vector.load %arg5[%c0_9, %c0_10] : memref<16x1xf32, #tpu.memory_space<vmem>>, vector<16x1xf32>
    %11 = vector.broadcast %10 : vector<16x1xf32> to vector<16x128xf32>
    %12 = arith.addf %9, %11 : vector<16x128xf32>
    %13 = arith.truncf %12 : vector<16x128xf32> to vector<16x128xbf16>
    %c0_11 = arith.constant 0 : index
    %c0_12 = arith.constant 0 : index
    %c0_13 = arith.constant 0 : index
    %14 = vector.load %arg6[%c0_11, %c0_12, %c0_13] : memref<1x16x128xbf16, #tpu.memory_space<vmem>>, vector<1x16x128xbf16>
    %15 = vector.shape_cast %14 : vector<1x16x128xbf16> to vector<16x128xbf16>
    %16 = vector.shape_cast %13 : vector<16x128xbf16> to vector<1x16x128xbf16>
    tpu.vector_store %arg6[%c0_11, %c0_12, %c0_13], %16 {strides = array<i32>} : memref<1x16x128xbf16, #tpu.memory_space<vmem>>, vector<1x16x128xbf16>,
    return
  }
  func.func @transform_0(%arg0: i32) -> (i32, i32) {
    %c0_i32 = arith.constant 0 : i32
    %c0_i32_0 = arith.constant 0 : i32
    return %c0_i32, %arg0 : i32, i32
  }
  func.func @transform_1(%arg0: i32) -> (i32, i32) {
    %c0_i32 = arith.constant 0 : i32
    %c0_i32_0 = arith.constant 0 : i32
    %c0_i32_1 = arith.constant 0 : i32
    return %c0_i32, %c0_i32_0 : i32, i32
  }
  func.func @transform_2(%arg0: i32) -> (i32, i32) {
    %c0_i32 = arith.constant 0 : i32
    %c0_i32_0 = arith.constant 0 : i32
    %c0_i32_1 = arith.constant 0 : i32
    return %c0_i32, %c0_i32_0 : i32, i32
  }
  func.func @transform_3(%arg0: i32) -> (i32, i32) {
    %c0_i32 = arith.constant 0 : i32
    %c0_i32_0 = arith.constant 0 : i32
    %c0_i32_1 = arith.constant 0 : i32
    return %c0_i32, %c0_i32_0 : i32, i32
  }
  func.func @transform_4(%arg0: i32) -> (i32, i32) {
    %c0_i32 = arith.constant 0 : i32
    %c0_i32_0 = arith.constant 0 : i32
    %c0_i32_1 = arith.constant 0 : i32
    return %c0_i32, %c0_i32_0 : i32, i32
  }
  func.func @transform_5(%arg0: i32) -> (i32, i32, i32) {
    %c0_i32 = arith.constant 0 : i32
    %c0_i32_0 = arith.constant 0 : i32
    %c0_i32_1 = arith.constant 0 : i32
    return %arg0, %c0_i32, %c0_i32_0 : i32, i32, i32
  }
}

</mosaic_0001>

<bundles_post_ra>
// kernel: tpu_custom_call.1
= control target key start
LH: loop header
LB: loop body
LE: loop exit
PB: predicated region body
PF: predicated region fallthrough
CT: control target
= control target key end

     0   :  { %vm50_vm0 = vcmask 64512   ;;  %v347_v5 = vmov 0   ;;  %s429_s0 = inlined_call_operand.vmem [shape: f32[8,128], index: 0, kind: input, shape index: {}]   ;;  %s430_s1 = inlined_call_operand.vmem [shape: f32[32,8], index: 1, kind: input, shape index: {}]   ;;  %s431_s2 = inlined_call_operand.vmem [shape: f32[32,1], index: 2, kind: input, shape index: {}]   ;;  %s432_s3 = inlined_call_operand.vmem [shape: f32[16,32], index: 3, kind: input, shape index: {}]   ;;  %s433_s4 = inlined_call_operand.vmem [shape: f32[16,1], index: 4, kind: input, shape index: {}]   ;;  %s434_s5 = inlined_call_operand.hbm [shape: bf16[1,16,128], index: 5, kind: output, shape index: {}]  }
   0x1   :  { %v25_v0 = vld [vmem:[%s429_s0] sm:$0xff]  ;;  %v22_v2 = vld [vmem:[%s430_s1 + $0x8] sm:$0xff]  ;;  %v23_v3 = vld [vmem:[%s430_s1 + $0x10] sm:$0xff]  ;;  %323 = vset.pattern.permute.xlu0 %v347_v5 }
   0x2   :  { %v21_v1 = vld [vmem:[%s430_s1] sm:$0xff]  ;;  %300 = vmatprep.subr.mxu0 %v25_v0  ;;  %v29_v4 = vld [vmem:[%s431_s2 + $0x18] sm:$0xff]  ;;  %v27_v6 = vld [vmem:[%s431_s2 + $0x8] sm:$0xff] }
   0x3   :  { %302 = vmatprep.mubr.msk.f32.mxu0 %vm50_vm0, %v21_v1  ;;  %301 = vmatpush3.msra.mxu0 %v25_v0 }
   0x4   :  { %303 = vmatmul.mubr.msk.f32.vlgmr.msra.gmra.mxu0 %vm50_vm0, %v22_v2  ;;  %47 = vperm.xlu0 %323, %v29_v4  }
   0x5   :  { %10 = vsyncpa [#allocation3], 0  ;;  %305 = vmatprep.mubr.msk.f32.mxu0 %vm50_vm0, %v23_v3  ;;  %v24_v7 = vld [vmem:[%s430_s1 + $0x18] sm:$0xff]  ;;  %324 = vset.pattern.permute.xlu1 %v347_v5  ;;  %v28_v8 = vld [vmem:[%s431_s2 + $0x10] sm:$0xff]  ;;  %vm166_vm1 = vcmask 261120   ;;  %s348_s15 = smov [#allocation2]  }
   0x6   :  { %37 = vperm.xlu1 %324, %v27_v6   ;;  %v26_v9 = vld [vmem:[%s431_s2] sm:$0xff]  ;;  %v155_v11 = vld [vmem:[%s433_s4 + $0x8] sm:$0xff]  ;;  %s263_s16 = sshll.u32 %s348_s15, 4  ;;  %s264_s16 = int_to_ptr.vmem [resolvable:$true] %s263_s16 }
   0x7   :  { %v154_v10 = vld [vmem:[%s433_s4] sm:$0xff]  ;;  %v153_v29 = vld [vmem:[%s432_s3 + $0x8] sm:$0xff]  ;;  %s325_s17 = scalar_lea.vmem %s264_s16, 128  ;;  %p330_p1 = scmp.lt.s32.totalorder %s264_s16, %s264_s16 }
   0x8   :  { %306 = vmatmul.mubr.msk.f32.gmra.mxu0 %vm50_vm0, %v24_v7  ;;  %42 = vperm.xlu0 %323, %v28_v8   ;;  %v152_v12 = vld [vmem:[%s432_s3] sm:$0xff]  ;;  %p326_p0 = scmp.ne.s32.totalorder %s264_s16, %s325_s17  ;;  %p331_p2 = scmp.lt.s32.totalorder %s325_s17, %s325_s17 }
   0x9   :  { %316 = vmatprep.mubr.msk.f32.mxu1 %vm166_vm1, %v152_v12 }
   0xa   :  { %32 = vperm.xlu1 %324, %v26_v9   ;;  %p332_p3 = por %p331_p2, %p330_p1 }
   0xc   :  { %158 = vperm.xlu0 %323, %v154_v10   ;;  %p333_p4 = pnand %p332_p3, %p326_p0 }
   0xe   :  { %163 = vperm.xlu1 %324, %v155_v11  }
  0x7f   :  { %v48_v13 = vpop.permute.xlu0 %47 }
  0x81   :  { %v38_v14 = vpop.permute.xlu1 %37 }
  0x83   :  { %v43_v18 = vpop.permute.xlu0 %42 }
  0x85   :  { %v33_v20 = vpop.permute.xlu1 %32 }
  0x87   :  { %v159_v31 = vpop.permute.xlu0 %158 }
  0x89   :  { %v164_v32 = vpop.permute.xlu1 %163 }
  0xc4   :  { %v304_v15 = vpop.f32.mrf.mxu0 }
  0xc5   :  { %v135_v22 = vadd.f32 %v304_v15, %v38_v14 }
  0xc6   :  { %v129_v16 = vpop.f32.mrf.mxu0 }
  0xc7   :  { %v130_v25 = vadd.f32 %v129_v16, %v33_v20  ;;  %v149_v27 = vmax.f32 %v135_v22, 0.0 }
  0xc8   :  { %v307_v17 = vpop.f32.mrf.mxu0 }
  0xc9   :  { %v145_v19 = vadd.f32 %v307_v17, %v48_v13  ;;  %v148_v28 = vmax.f32 %v130_v25, 0.0 }
  0xca   :  { %v139_v21 = vpop.f32.mrf.mxu0 }
  0xcb   :  { %v151_v23 = vmax.f32 %v145_v19, 0.0  ;;  %v140_v24 = vadd.f32 %v139_v21, %v43_v18 }
  0xcd   :  { %v150_v26 = vmax.f32 %v140_v24, 0.0  ;;  %308 = vmatprep.subr.mxu1 %v151_v23 }
  0xce   :  { %309 = vmatpush3.msra.mxu1 %v151_v23 }
  0xcf   :  { %310 = vmatprep.subr.mxu1 %v150_v26 }
  0xd0   :  { %311 = vmatpush3.msra.mxu1 %v150_v26 }
  0xd1   :  { %312 = vmatprep.subr.mxu1 %v149_v27 }
  0xd2   :  { %313 = vmatpush3.msra.mxu1 %v149_v27 }
  0xd3   :  { %314 = vmatprep.subr.mxu1 %v148_v28 }
  0xd4   :  { %315 = vmatpush3.msra.mxu1 %v148_v28 }
  0xd5   :  { %317 = vmatmul.mubr.msk.f32.vlgmr.msra.gmra.mxu1 %vm166_vm1, %v153_v29 }
 0x195   :  { %v318_v30 = vpop.f32.mrf.mxu1 }
 0x196   :  { %v245_v34 = vadd.f32 %v318_v30, %v164_v32 }
 0x197   :  { %v239_v33 = vpop.f32.mrf.mxu1 }
 0x198   :  { %v240_v35 = vadd.f32 %v239_v33, %v159_v31 }
 0x19a   :  { %v287_v36 = vpack.c.bf16 %v245_v34, %v240_v35 }
 0x19c   :  { %288 = vst [vmem:[#allocation2] sm:$0xff] %v287_v36  }
 0x19d   :  { %336 = shalt.err (!%p333_p4)
}
 0x19e   :  { %s349_s3 = smov 64   ;;  %s350_s18 = smov 4  }
 0x19f   :  { %269 = dma.vmem_to_hbm [thread:$0]  %s264_s16, 128, %s434_s5, [#allocation3], %s349_s3, %s349_s3, %s350_s18  }
 0x1a0   :  { %345 = dma.done.wait [#allocation3], 128  }
 0x1a1   :  { %346 = vsyncadd [#allocation3], 4294967168 }
 0x1a2   :  { %273 = vsyncpa [#allocation3], 1 }

</bundles_post_ra>
